<compile_context>
chip_gen: v7x
topology: tpu7x:2x2x1
jax: 0.10.0
libtpu: 0.0.40
codegen_flags: <defaults>
</compile_context>

<pallas_src>
import jax
import jax.numpy as jnp
from jax.experimental import pallas as pl
from jax.experimental.pallas import tpu as pltpu


def _pick_row_tile(h, w, c_in, c_y, c_out, vmem_budget_bytes):
    """Pick nrows (a divisor of H). One tile = nrows low-res rows = nrows*W pixels."""
    hw = h * w
    c_tot = c_y + c_out

    def est_bytes(tp):
        # double-buffered x / y / out blocks + resident dup matrix (x2) + weights/bias
        blocks = 2 * (c_in * tp + c_y * 4 * tp + c_tot * 4 * tp)
        resident = 2 * (tp * 4 * tp) + c_out * c_in + c_out
        return 4 * (blocks + resident)

    feasible = []
    for nrows in range(h, 0, -1):
        if h % nrows:
            continue
        tp = nrows * w
        # BlockSpec rule: minor block dim must be a multiple of 128 or the full dim.
        if (4 * tp) % 128 != 0 and tp != hw:
            continue
        if est_bytes(tp) > vmem_budget_bytes:
            continue
        feasible.append(nrows)
    if not feasible:
        return h
    # Prefer >=2 pixel tiles (more parallel grid programs for v7x's 2 TensorCores and
    # better DMA/compute overlap) as long as the output tile stays lane-dense (>=512).
    for nrows in feasible:          # feasible is sorted largest-first
        if hw // (nrows * w) >= 2 and 4 * nrows * w >= 512:
            return nrows
    return feasible[0]


def _fused_kernel(w_ref, b_ref, dup_ref, x_ref, y_ref, o_ref):
    # w_ref: (Cout, Cin)    b_ref: (Cout, 1)     dup_ref: (tp, 4*tp)
    # x_ref: (Cin, tp)      y_ref: (Cy, 4*tp)    o_ref:  (Cy+Cout, 4*tp)
    cy = y_ref.shape[0]
    # 1x1 conv == channel matmul on the LOW-res tile (commutes with nearest upsample).
    z = jnp.dot(w_ref[...], x_ref[...], preferred_element_type=jnp.float32) + b_ref[...]
    # Nearest-2x duplication of the flattened (nrows, W) tile -> flattened
    # (2*nrows, 2W) slab via a 0/1 operator on the MXU (MXU is idle; op is HBM-bound).
    up = jnp.dot(z, dup_ref[...], preferred_element_type=jnp.float32)
    # Fused concat: y in channels [0, Cy), upsampled conv in channels [Cy, Cy+Cout).
    o_ref[0:cy, :] = y_ref[...]
    o_ref[cy:cy + up.shape[0], :] = up.astype(o_ref.dtype)


def upsampling_forward(x_nchw, y_nchw, conv_weight, conv_bias,
                       *, vmem_budget_bytes=20 * 1024 * 1024):
    """UpSampling.forward:
         up  = F.interpolate(x, scale_factor=2, mode='nearest')
         out = Conv2d(C, C//2, 1, 1)(up)              # with bias
         return cat((y, out), dim=1)
    """
    n, c, h, w = x_nchw.shape
    c_out = conv_weight.shape[0]                       # == C // 2
    ny, c_y, hy, wy = y_nchw.shape
    assert ny == n and hy == 2 * h and wy == 2 * w, (y_nchw.shape, x_nchw.shape)
    c_tot = c_y + c_out
    hw = h * w

    # Pure-metadata views: channels on sublanes, flattened pixels on lanes.
    x3 = x_nchw.reshape(n, c, hw).astype(jnp.float32)            # (N, C, HW)
    y3 = y_nchw.reshape(n, c_y, 4 * hw).astype(jnp.float32)      # (N, Cy, 4HW)
    w2 = conv_weight.reshape(c_out, c).astype(jnp.float32)       # (Cout, Cin)
    b2 = conv_bias.reshape(c_out, 1).astype(jnp.float32)         # (Cout, 1)

    nrows = _pick_row_tile(h, w, c, c_y, c_out, vmem_budget_bytes)
    tp = nrows * w                                               # low-res pixels / tile
    n_tiles = hw // tp                                           # exact (no pad/slice)

    # Duplication operator: dup[j, q] = 1 iff high-res flat index q (within the 4*tp
    # slab) is one of the 4 nearest-neighbour copies of low-res flat index j.
    q = jnp.arange(4 * tp)
    src = (q // (4 * w)) * w + (q % (2 * w)) // 2
    dup = (src[None, :] == jnp.arange(tp)[:, None]).astype(jnp.float32)   # (tp, 4*tp)

    grid = (n, n_tiles)

    out_flat = pl.pallas_call(
        _fused_kernel,
        out_shape=jax.ShapeDtypeStruct((n, c_tot, 4 * hw), jnp.float32),
        grid=grid,
        in_specs=[
            pl.BlockSpec((c_out, c), lambda i, p: (0, 0)),              # weights (resident)
            pl.BlockSpec((c_out, 1), lambda i, p: (0, 0)),              # bias    (resident)
            pl.BlockSpec((tp, 4 * tp), lambda i, p: (0, 0)),            # dup op  (resident)
            pl.BlockSpec((None, c, tp), lambda i, p: (i, 0, p)),        # x tile  (low-res)
            pl.BlockSpec((None, c_y, 4 * tp), lambda i, p: (i, 0, p)),  # y tile  (hi-res)
        ],
        out_specs=pl.BlockSpec((None, c_tot, 4 * tp), lambda i, p: (i, 0, p)),
        compiler_params=pltpu.CompilerParams(
            dimension_semantics=("parallel", "parallel"),
            vmem_limit_bytes=32 * 1024 * 1024),
        cost_estimate=pl.CostEstimate(
            flops=2 * n * hw * c * c_out + 2 * n * hw * c_out * 4 * tp,
            transcendentals=0,
            bytes_accessed=4 * (n * c * hw          # x read
                                + n * c_y * 4 * hw  # y read
                                + n * c_tot * 4 * hw  # fused output write
                                + tp * 4 * tp + c_out * c + c_out)),
    )(w2, b2, dup, x3, y3)

    # Metadata-only reshape back to NCHW.
    return out_flat.reshape(n, c_tot, 2 * h, 2 * w)


def _reference_forward(x_nchw, y_nchw, conv_weight, conv_bias):
    """Pure-JAX reference reproducing the PyTorch op order (upsample, then conv)."""
    up = jnp.repeat(jnp.repeat(x_nchw, 2, axis=2), 2, axis=3)
    c_out, c = conv_weight.shape[0], conv_weight.shape[1]
    out = jnp.einsum("oc,nchw->nohw", conv_weight.reshape(c_out, c), up)
    out = out + conv_bias.reshape(1, c_out, 1, 1)
    return jnp.concatenate([y_nchw, out], axis=1)


if __name__ == "__main__":
    key = jax.random.PRNGKey(0)
    k_x, k_y, k_w, k_b = jax.random.split(key, 4)

    N, C, H, W = 2, 4, 16, 16
    C_OUT = C // 2
    x = jax.random.normal(k_x, (N, C, H, W), dtype=jnp.float32)
    # skip-connection tensor y: upsampled spatial size, C//2 channels
    y = jax.random.normal(k_y, (N, C_OUT, 2 * H, 2 * W), dtype=jnp.float32)

    fan_in = C * 1 * 1
    conv_weight = jax.random.normal(k_w, (C_OUT, C, 1, 1), dtype=jnp.float32) / jnp.sqrt(fan_in)
    conv_bias = 0.1 * jax.random.normal(k_b, (C_OUT,), dtype=jnp.float32)

    out = upsampling_forward(x, y, conv_weight, conv_bias)
    out = jax.block_until_ready(out)

    ref = _reference_forward(x, y, conv_weight, conv_bias)
    assert out.shape == (N, C_OUT + C_OUT, 2 * H, 2 * W), out.shape
    max_err = float(jnp.max(jnp.abs(out - ref)))
    assert jnp.allclose(out, ref, atol=2e-4, rtol=2e-4), max_err

    print("KERNEL_OK")
</pallas_src>

<mosaic_0001>
module attributes {stable_mosaic.version = 11 : i64} {
  func.func @_fused_kernel(%arg0: i32, %arg1: i32, %arg2: memref<2x4xf32, #tpu.memory_space<vmem>>, %arg3: memref<2x1xf32, #tpu.memory_space<vmem>>, %arg4: memref<128x512xf32, #tpu.memory_space<vmem>>, %arg5: memref<1x4x128xf32, #tpu.memory_space<vmem>>, %arg6: memref<1x2x512xf32, #tpu.memory_space<vmem>>, %arg7: memref<1x4x512xf32, #tpu.memory_space<vmem>>) attributes {dimension_semantics = [#tpu.dimension_semantics<parallel>, #tpu.dimension_semantics<parallel>], iteration_bounds = array<i64: 2, 2>, scalar_prefetch = 0 : i64, scratch_operands = 0 : i64, tpu.core_type = #tpu.core_type<tc>, window_params = [{pipeline_mode = #tpu.pipeline_mode<synchronous>, transform_indices = @transform_0, window_bounds = array<i64: 2, 4>}, {pipeline_mode = #tpu.pipeline_mode<synchronous>, transform_indices = @transform_1, window_bounds = array<i64: 2, 1>}, {pipeline_mode = #tpu.pipeline_mode<synchronous>, transform_indices = @transform_2, window_bounds = array<i64: 128, 512>}, {transform_indices = @transform_3, window_bounds = array<i64: 1, 4, 128>}, {transform_indices = @transform_4, window_bounds = array<i64: 1, 2, 512>}, {transform_indices = @transform_5, window_bounds = array<i64: 1, 4, 512>}]} {
    %c0 = arith.constant 0 : index
    %c0_0 = arith.constant 0 : index
    %0 = vector.load %arg2[%c0, %c0_0] : memref<2x4xf32, #tpu.memory_space<vmem>>, vector<2x4xf32>
    %c0_1 = arith.constant 0 : index
    %c0_2 = arith.constant 0 : index
    %c0_3 = arith.constant 0 : index
    %1 = vector.load %arg5[%c0_1, %c0_2, %c0_3] : memref<1x4x128xf32, #tpu.memory_space<vmem>>, vector<1x4x128xf32>
    %2 = vector.shape_cast %1 : vector<1x4x128xf32> to vector<4x128xf32>
    %cst = arith.constant dense<0.000000e+00> : vector<2x128xf32>
    %3 = tpu.matmul %0, %2, %cst {dimension_numbers = #tpu.dot_dimension_numbers<[1], [0], [0], [1], [0, 0, 1, 1], [], []>} : vector<2x4xf32>, vector<4x128xf32>, vector<2x128xf32> -> vector<2x128xf32>
    %c0_4 = arith.constant 0 : index
    %c0_5 = arith.constant 0 : index
    %4 = vector.load %arg3[%c0_4, %c0_5] : memref<2x1xf32, #tpu.memory_space<vmem>>, vector<2x1xf32>
    %5 = vector.broadcast %4 : vector<2x1xf32> to vector<2x128xf32>
    %6 = arith.addf %3, %5 : vector<2x128xf32>
    %c0_6 = arith.constant 0 : index
    %c0_7 = arith.constant 0 : index
    %7 = vector.load %arg4[%c0_6, %c0_7] : memref<128x512xf32, #tpu.memory_space<vmem>>, vector<128x512xf32>
    %cst_8 = arith.constant dense<0.000000e+00> : vector<2x512xf32>
    %8 = tpu.matmul %6, %7, %cst_8 {dimension_numbers = #tpu.dot_dimension_numbers<[1], [0], [0], [1], [0, 0, 1, 1], [], []>} : vector<2x128xf32>, vector<128x512xf32>, vector<2x512xf32> -> vector<2x512xf32>
    %c0_9 = arith.constant 0 : index
    %c0_10 = arith.constant 0 : index
    %c0_11 = arith.constant 0 : index
    %9 = vector.load %arg6[%c0_9, %c0_10, %c0_11] : memref<1x2x512xf32, #tpu.memory_space<vmem>>, vector<1x2x512xf32>
    %10 = vector.shape_cast %9 : vector<1x2x512xf32> to vector<2x512xf32>
    %c0_12 = arith.constant 0 : index
    %c0_13 = arith.constant 0 : index
    %c0_14 = arith.constant 0 : index
    %11 = vector.load %arg7[%c0_12, %c0_13, %c0_14] : memref<1x4x512xf32, #tpu.memory_space<vmem>>, vector<1x2x512xf32>
    %12 = vector.shape_cast %11 : vector<1x2x512xf32> to vector<2x512xf32>
    %13 = vector.shape_cast %10 : vector<2x512xf32> to vector<1x2x512xf32>
    tpu.vector_store %arg7[%c0_12, %c0_13, %c0_14], %13 {strides = array<i32>} : memref<1x4x512xf32, #tpu.memory_space<vmem>>, vector<1x2x512xf32>,
    %c0_15 = arith.constant 0 : index
    %c2 = arith.constant 2 : index
    %c0_16 = arith.constant 0 : index
    %14 = vector.load %arg7[%c0_15, %c2, %c0_16] : memref<1x4x512xf32, #tpu.memory_space<vmem>>, vector<1x2x512xf32>
    %15 = vector.shape_cast %14 : vector<1x2x512xf32> to vector<2x512xf32>
    %16 = vector.shape_cast %8 : vector<2x512xf32> to vector<1x2x512xf32>
    tpu.vector_store %arg7[%c0_15, %c2, %c0_16], %16 {strides = array<i32>} : memref<1x4x512xf32, #tpu.memory_space<vmem>>, vector<1x2x512xf32>,
    return
  }
  func.func @transform_0(%arg0: i32, %arg1: i32) -> (i32, i32) {
    %c0_i32 = arith.constant 0 : i32
    %c0_i32_0 = arith.constant 0 : i32
    %c0_i32_1 = arith.constant 0 : i32
    return %c0_i32, %c0_i32_0 : i32, i32
  }
  func.func @transform_1(%arg0: i32, %arg1: i32) -> (i32, i32) {
    %c0_i32 = arith.constant 0 : i32
    %c0_i32_0 = arith.constant 0 : i32
    %c0_i32_1 = arith.constant 0 : i32
    return %c0_i32, %c0_i32_0 : i32, i32
  }
  func.func @transform_2(%arg0: i32, %arg1: i32) -> (i32, i32) {
    %c0_i32 = arith.constant 0 : i32
    %c0_i32_0 = arith.constant 0 : i32
    %c0_i32_1 = arith.constant 0 : i32
    return %c0_i32, %c0_i32_0 : i32, i32
  }
  func.func @transform_3(%arg0: i32, %arg1: i32) -> (i32, i32, i32) {
    %c0_i32 = arith.constant 0 : i32
    %c0_i32_0 = arith.constant 0 : i32
    return %arg0, %c0_i32, %arg1 : i32, i32, i32
  }
  func.func @transform_4(%arg0: i32, %arg1: i32) -> (i32, i32, i32) {
    %c0_i32 = arith.constant 0 : i32
    %c0_i32_0 = arith.constant 0 : i32
    return %arg0, %c0_i32, %arg1 : i32, i32, i32
  }
  func.func @transform_5(%arg0: i32, %arg1: i32) -> (i32, i32, i32) {
    %c0_i32 = arith.constant 0 : i32
    %c0_i32_0 = arith.constant 0 : i32
    return %arg0, %c0_i32, %arg1 : i32, i32, i32
  }
}

</mosaic_0001>

<bundles_post_ra>
// kernel: tpu_custom_call.1
= control target key start
LH: loop header
LB: loop body
LE: loop exit
PB: predicated region body
PF: predicated region fallthrough
CT: control target
= control target key end

     0   :  { %s1494_s0 = inlined_call_operand.vmem [shape: f32[2,4], index: 0, kind: input, shape index: {}]   ;;  %s1495_s1 = inlined_call_operand.vmem [shape: f32[2,1], index: 1, kind: input, shape index: {}]   ;;  %s1496_s2 = inlined_call_operand.hbm [shape: f32[128,512], index: 2, kind: input, shape index: {}]   ;;  %s1497_s3 = inlined_call_operand.hbm [shape: f32[2,4,256], index: 3, kind: input, shape index: {}]   ;;  %s1498_s4 = inlined_call_operand.hbm [shape: f32[2,2,1024], index: 4, kind: input, shape index: {}]   ;;  %s1499_s5 = inlined_call_operand.hbm [shape: f32[2,4,1024], index: 5, kind: output, shape index: {}]  }
   0x1   :  { %1515 = sst [smem:[#allocation20_spill]] %s1497_s3 }
   0x2   :  { %1516 = sst [smem:[#allocation21_spill]] %s1499_s5 }
   0x3   :  { %10 = vsyncpa [#allocation3], 0 }
   0x4   :  { %11 = vsyncpa [#allocation6], 0 }
   0x5   :  { %13 = vsyncpa [#allocation6 + $0x1], 0 }
   0x6   :  { %14 = vsyncpa [#allocation4], 0 }
   0x7   :  { %16 = vsyncpa [#allocation4 + $0x1], 0  ;;  %s1207_s18 = smov 0   ;;  %s1209_s19 = smov 0  }
   0x8   :  { %s1211_s20 = smov 0   ;;  %s1213_s21 = smov 0  }
   0x9   :  { %s1215_s22 = smov 0   ;;  %s1217_s23 = smov 0  }
   0xa   :  { %s1219_s24 = smov 0   ;;  %s1221_s25 = smov 0  }
   0xb LB: > { %1517 = sst [smem:[#allocation12_spill]] %s1138_s18  ;;  %s31_s26 = sadd.s32 1, %s1158_s23  ;;  %s1166_s25 = sphi %s1221_s25, %s22_s25   ;;  %s1162_s24 = sphi %s1219_s24, %s1550_s24   ;;  %s1158_s23 = sphi %s1217_s23, %s1549_s23   ;;  %s1154_s22 = sphi %s1215_s22, %s1548_s22   ;;  %s1150_s21 = sphi %s1213_s21, %s1547_s21   ;;  %s1146_s20 = sphi %s1211_s20, %s1546_s20   ;;  %s1142_s19 = sphi %s1209_s19, %s1552_s19   ;;  %s1138_s18 = sphi %s1207_s18, %s1551_s18  }
   0xc   : > { %1518 = sst [smem:[#allocation13_spill]] %s1146_s20  ;;  %s34_s27 = sadd.s32 1, %s1162_s24 }
   0xd   : > { %1519 = sst [smem:[#allocation14_spill]] %s1158_s23  ;;  %p32_p0 = scmp.ge.s32.totalorder %s31_s26, 2 }
   0xe   : > { %1520 = sst [smem:[#allocation15_spill]] %s1162_s24  ;;  %s106_s28 = sadd.s32 1, %s1146_s20 }
   0xf   : > { %p113_p1 = scmp.ne.s32.totalorder %s1146_s20, %s1142_s19  ;;  %p114_p2 = scmp.eq.s32.totalorder %s1166_s25, 0 }
  0x10   : > { %s1554_s26 = smov (%p32_p0, %s31_s26), 0  ;;  %s1556_s27 = smov (!%p32_p0, %s34_s27), %s1162_s24 }
  0x11   : > { %1521 = sst [smem:[#allocation16_spill]] %s1554_s26  ;;  %s102_s29 = ssub.s32 %s1158_s23, %s1554_s26 }
  0x12   : > { %p1261_p3 = por %p114_p2, %p113_p1  ;;  %p36_p4 = scmp.ge.s32.totalorder %s1556_s27, 2 }
  0x13   : > { %p901_p5 = scmp.lt.s32.totalorder %s1166_s25, 4  ;;  %s218_s6 = sand.u32 1, %s1166_s25  }
  0x14   : > { %s1558_s27 = smov (%p36_p4, %s1556_s27), 0  ;;  %s220_s7 = sand.u32 1, %s1146_s20  }
  0x15   : > { %1523 = sst [smem:[#allocation17_spill]] %s1558_s27  ;;  %s101_s8 = ssub.s32 %s1162_s24, %s1558_s27 }
  0x16   : > { %s782_s9 = sshll.u32 %s220_s7, 2  ;;  %s103_s10 = sor.u32 %s102_s29, %s101_s8 }
  0x17   : > { %p104_p6 = scmp.eq.s32.totalorder %s103_s10, 0  ;;  %s783_s11 = sshll.u32 %s1162_s24, 1 }
  0x18   : > { %s227_s12 = sadd.s32 %s1158_s23, %s783_s11  ;;  %s222_s13 = scalar_lea.vmem [#allocation5], %s782_s9 }
  0x19   : > { %s231_s14 = sshll.u32 %s222_s13, 4  ;;  %s784_s16 = sshll.u32 %s227_s12, 6  ;;  %s1277_s14 = int_to_ptr.vmem [resolvable:$true] %s231_s14 }
  0x1a   : > { %s1275_s15 = scalar_select %p104_p6, %s1146_s20, %s106_s28  }
  0x1b   : > { %s1525_s3 = sld [smem:[#allocation20_spill]]  ;;  %p1288_p7 = pnand %p901_p5, %p1261_p3 }
  0x1c   : > { %1524 = sst [smem:[#allocation18_spill]] %s1275_s15  ;;  %s1292_s28 = sshll.u32 %s220_s7, 3 }
  0x1d   : > { %s1526_s29 = scalar_select %p1288_p7, 1, 0 }
  0x1e   : > { %s1294_s8 = scalar_lea.sflag [#allocation6], %s218_s6  ;;  %p1509_p9 = pneg %p1288_p7 }
  0x21   : > { %s1282_s5 = scalar_lea.hbm %s1525_s3, %s784_s16  ;;  %s981_s10 = scalar_lea.hbm %s1525_s3, 256 }
  0x22   : > { %s976_s9 = scalar_lea.hbm %s1282_s5, 64  ;;  %p982_p12 = scmp.lt.u32.totalorder %s1282_s5, %s1525_s3 }
  0x23   : > { %p977_p8 = scmp.ne.s32.totalorder %s1282_s5, %s976_s9  ;;  %p983_p13 = scmp.lt.u32.totalorder %s981_s10, %s976_s9 }
  0x24   : > { %p985_p2 = scmp.lt.u32.totalorder %s976_s9, %s1282_s5 }
  0x25   : > { %p979_p10 = pnand %p1509_p9, %p977_p8  ;;  %p984_p0 = por %p983_p13, %p982_p12 }
  0x27   : > { %p980_p11 = pneg %p979_p10  ;;  %p986_p3 = por %p985_p2, %p984_p0 }
  0x29   : > { %p987_p4 = pnand %p986_p3, %p980_p11 }
  0x2b   : > { %990 = shalt.err (!%p987_p4)
}
  0x2c   : > { %s991_s6 = scalar_lea.vmem %s1277_s14, 64  ;;  %s1168_s7 = smov [#allocation5]  }
  0x2d   : > { %p992_p5 = scmp.ne.s32.totalorder %s1277_s14, %s991_s6  ;;  %s996_s13 = sshll.u32 %s1168_s7, 4  ;;  %s997_s13 = int_to_ptr.vmem [resolvable:$false] %s996_s13 }
  0x2e   : > { %s998_s16 = scalar_lea.vmem %s997_s13, 128  ;;  %p999_p10 = scmp.lt.s32.totalorder %s1277_s14, %s997_s13 }
  0x2f   : > { %p994_p6 = pnand %p992_p5, %p1509_p9  ;;  %p1000_p12 = scmp.lt.s32.totalorder %s998_s16, %s991_s6 }
  0x31   : > { %p995_p8 = pneg %p994_p6  ;;  %p1001_p13 = por %p1000_p12, %p999_p10 }
  0x33   : > { %p1002_p0 = pnand %p1001_p13, %p995_p8 }
  0x35   : > { %1005 = shalt.err (!%p1002_p0)
}
  0x36   : > { %892 = dma.hbm_to_vmem [thread:$0]  (!%p1288_p7), %s1282_s5, 64, %s1277_s14, %s1294_s8  }
  0x37   : > { %s1323_s17 = sadd.s32 4294967295, %s1166_s25   ;;  %s778_s9 = sadd.s32 4294967294, %s1166_s25  }
  0x38   : > { %p119_p11 = scmp.ne.s32.totalorder %s1142_s19, %s1138_s18  ;;  %p1508_p2 = scmp.eq.s32.totalorder %s1323_s17, 0 }
  0x39   : > { %p173_p3 = scmp.eq.s32.totalorder %s1323_s17, 3  ;;  %p179_p4 = scmp.eq.s32.totalorder %s778_s9, 3 }
  0x3a   : > { %p1332_p5 = por %p1508_p2, %p119_p11  ;;  %p779_p6 = scmp.ge.s32.totalorder %s1166_s25, 1 }
  0x3b   : > { %p1340_p8 = por %p173_p3, %p113_p1  ;;  %p1344_p10 = por %p179_p4, %p119_p11 }
  0x3c   : > { %s1527_s26 = scalar_select %p1332_p5, 1, 0 }
  0x3d   : > { %s1528_s5 = scalar_select %p1340_p8, 1, 0 }
  0x3e   : > { %s1529_s14 = scalar_select %p1344_p10, 1, 0 }
  0x3f   : > { %p186_p12 = scmp.lt.s32.totalorder %s1166_s25, 5  ;;  %s1169_s10 = smov [#allocation2]  }
  0x40   : > { %1530 = sst [smem:[#allocation19_spill]] %s1529_s14  ;;  %s204_s11 = sshll.u32 %s1169_s10, 4  ;;  %s1353_s11 = int_to_ptr.vmem [resolvable:$true] %s204_s11 }
  0x41   : > { %p1349_p13 = pnand %p779_p6, %p186_p12  ;;  %s786_s12 = sshll.u32 %s1158_s23, 2 }
  0x42   : > { %s787_s6 = sshll.u32 %s1162_s24, 3  ;;  %s242_s9 = scalar_lea.vmem [#allocation7], %s1292_s28 }
  0x43   : > { %s1531_s30 = scalar_select %p1349_p13, 1, 0 }
  0x44   : > { %p885_p0 = pneg %p1349_p13  ;;  %s248_s13 = sadd.s32 %s787_s6, %s786_s12 }
  0x45   : > { %s788_s16 = sshll.u32 %s248_s13, 5  ;;  %s252_s3 = sshll.u32 %s242_s9, 4  ;;  %s253_s3 = int_to_ptr.vmem [resolvable:$true] %s252_s3 }
  0x46   : > { %p1361_p1 = pnand %p885_p0, %p1508_p2  ;;  %s1369_s10 = scalar_lea.hbm %s1498_s4, %s788_s16 }
  0x47   : > { %s1006_s23 = scalar_lea.hbm %s1496_s2, 8192 }
  0x48   : > { %p1007_p11 = scmp.ne.s32.totalorder %s1496_s2, %s1006_s23  ;;  %p1008_p3 = pneg %p1361_p1 }
  0x49   : > { %p1013_p12 = scmp.lt.u32.totalorder %s1006_s23, %s1496_s2 }
  0x4a   : > { %p1009_p4 = pnand %p1008_p3, %p1007_p11 }
  0x4c   : > { %p1010_p6 = pneg %p1009_p4 }
  0x4e   : > { %p1015_p0 = pnand %p1013_p12, %p1010_p6 }
  0x50   : > { %1018 = shalt.err (!%p1015_p0)
}
  0x51   : > { %s1019_s27 = scalar_lea.vmem %s1353_s11, 8192  ;;  %p1027_p8 = scmp.lt.s32.totalorder %s1353_s11, %s1353_s11 }
  0x52   : > { %p1020_p2 = scmp.ne.s32.totalorder %s1353_s11, %s1019_s27  ;;  %p1028_p5 = scmp.lt.s32.totalorder %s1019_s27, %s1019_s27 }
  0x54   : > { %p1022_p9 = pnand %p1020_p2, %p1008_p3  ;;  %p1029_p13 = por %p1028_p5, %p1027_p8 }
  0x56   : > { %p1023_p10 = pneg %p1022_p9 }
  0x58   : > { %p1030_p7 = pnand %p1029_p13, %p1023_p10 }
  0x5a   : > { %1033 = shalt.err (!%p1030_p7)
}
  0x5b   : > { %s1170_s18 = smov 512   ;;  %s1171_s20 = smov 32  }
  0x5c   : > { %888 = dma.hbm_to_vmem [thread:$0]  (!%p1361_p1), %s1496_s2, 8192, %s1353_s11, [#allocation3], %s1170_s18, %s1170_s18, %s1171_s20  }
  0x5d   : > { %s1034_s15 = scalar_lea.hbm %s1369_s10, 128  ;;  %p1533_p2 = scmp.ne.s32.totalorder %s1526_s29, 0 }
  0x5e   : > { %p1035_p9 = scmp.ne.s32.totalorder %s1369_s10, %s1034_s15  ;;  %s1039_s13 = scalar_lea.hbm %s1498_s4, 512 }
  0x5f   : > { %p1534_p5 = pneg %p1533_p2  ;;  %p1040_p10 = scmp.lt.u32.totalorder %s1369_s10, %s1498_s4 }
  0x60   : > { %p1041_p13 = scmp.lt.u32.totalorder %s1039_s13, %s1034_s15  ;;  %p1043_p3 = scmp.lt.u32.totalorder %s1034_s15, %s1369_s10 }
  0x61   : > { %p1037_p7 = pnand %p1035_p9, %p1534_p5 }
  0x62   : > { %p1042_p11 = por %p1041_p13, %p1040_p10 }
  0x63   : > { %p1038_p8 = pneg %p1037_p7 }
  0x64   : > { %p1044_p4 = por %p1043_p3, %p1042_p11 }
  0x66   : > { %p1045_p1 = pnand %p1044_p4, %p1038_p8 }
  0x68   : > { %1048 = shalt.err (!%p1045_p1)
}
  0x69   : > { %s1049_s11 = scalar_lea.vmem %s253_s3, 128  ;;  %p1535_p12 = pmov %p1534_p5 }
  0x6a   : > { %p1050_p6 = scmp.ne.s32.totalorder %s253_s3, %s1049_s11  ;;  %s1172_s7 = smov [#allocation7]  }
  0x6b   : > { %s1054_s12 = sshll.u32 %s1172_s7, 4  ;;  %s1055_s12 = int_to_ptr.vmem [resolvable:$false] %s1054_s12 }
  0x6c   : > { %p1052_p0 = pnand %p1050_p6, %p1535_p12  ;;  %s1056_s28 = scalar_lea.vmem %s1055_s12, 256 }
  0x6d   : > { %p1057_p5 = scmp.lt.s32.totalorder %s253_s3, %s1055_s12  ;;  %p1058_p7 = scmp.lt.s32.totalorder %s1056_s28, %s1049_s11 }
  0x6e   : > { %p1053_p9 = pneg %p1052_p0 }
  0x6f   : > { %p1059_p10 = por %p1058_p7, %p1057_p5 }
  0x71   : > { %p1060_p13 = pnand %p1059_p10, %p1053_p9 }
  0x73   : > { %1063 = shalt.err (!%p1060_p13)
}
  0x74   : > { %895 = dma.hbm_to_vmem [thread:$0]  (!%p1533_p2), %s1369_s10, 128, %s253_s3, %s1294_s8  }
  0x75   : > { %p1536_p8 = scmp.ne.s32.totalorder %s1531_s30, 0 }
  0x76   : > { %p1537_p11 = scmp.eq.s32.totalorder (!%p1536_p8), %s1323_s17, 0 }
  0x77   : > { %261 = sbr.rel (%p1536_p8) target bundleno = 581 (0x245), region = 40 }
  0x7e   : > { %1125 = dma.done.wait (%p1537_p11), [#allocation3], 8192   ;;  %p1538_p3 = pmov %p1537_p11 }
  0x7f   : > { %s267_s27 = sand.u32 1, %s1323_s17   ;;  %s1420_s18 = sand.u32 1, %s1142_s19  }
  0x80   : > { %1127 = vsyncadd (%p1538_p3), [#allocation3], 4294959104  ;;  %s791_s29 = sshll.u32 %s1420_s18, 2  ;;  %s268_s20 = scalar_lea.sflag [#allocation6], %s267_s27 }
  0x81   : > { %s271_s23 = scalar_lea.vmem [#allocation5], %s791_s29  ;;  %p1539_p2 = scmp.ne.s32.totalorder %s1527_s26, 0 }
  0x83   : > { %1129 = dma.done.wait (%p1539_p2), %s268_s20, 192  }
  0x84   : > { %1131 = vsyncadd (%p1539_p2), %s268_s20, 4294967104  ;;  %v1173_v0 = vmov 0.0   ;;  %vm1174_vm0 = vmmov 0   ;;  %v1175_v1 = vmov 0   ;;  %vm326_vm1 = vcmask 1043456   ;;  %v401_v5 = vld [vmem:[#allocation2 + $0x8] sm:$0xff] }
  0x85   : > { %806 = vmatprep.subr.mxu0 %v1173_v0  ;;  %808 = vmatprep.mubr.msk.f32.mxu0 %vm1174_vm0, %v1173_v0  ;;  %vm322_vm2 = vcmask 31744   ;;  %v315_v2 = vld [vmem:[%s271_s23] sm:$0xf]  ;;  %v405_v6 = vld [vmem:[#allocation2 + $0x28] sm:$0xff]  ;;  %v403_v7 = vld [vmem:[#allocation2 + $0x18] sm:$0xff]  ;;  %s793_s26 = sshll.u32 %s1420_s18, 4 }
  0x86   : > { %974 = vset.pattern.permute.xlu0 %v1175_v1  ;;  %528 = vmatprep.mubr.f32.mxu1 %v1173_v0  ;;  %v314_v3 = vld [vmem:[%s1494_s0] sm:$0x3]  ;;  %v811_v8 = vpack.c.bf16 %v405_v6, %v401_v5  ;;  %v407_v9 = vld [vmem:[#allocation2 + $0x38] sm:$0xff]  ;;  %v402_v14 = vld [vmem:[#allocation2 + $0x10] sm:$0xff]  ;;  %s792_s10 = sshll.u32 %s1420_s18, 3  ;;  %s311_s15 = scalar_lea.vmem [#allocation8], %s793_s26 }
  0x87   : > { %v316_v4 = vld [vmem:[%s1495_s1] sm:$0x3]  ;;  %807 = vmatpush3.msk.msra.mxu0 %vm326_vm1, %v315_v2  ;;  %v843_v12 = vpack.c.bf16 %v407_v9, %v403_v7  ;;  %v406_v15 = vld [vmem:[#allocation2 + $0x30] sm:$0xff]  ;;  %v409_v16 = vld [vmem:[#allocation2 + $0x48] sm:$0xff]  ;;  %s280_s24 = scalar_lea.vmem [#allocation7], %s792_s10  ;;  %s799_s14 = sshll.u32 %s1150_s21, 2 }
  0x88   : > { %319 = vperm.xlu0 %974, %v316_v4   ;;  %809 = vmatmul.mubr.msk.f32.vlgmr.msra.gmra.mrb[0].mxu0 %vm322_vm2, %v314_v3  ;;  %v400_v10 = vld [vmem:[#allocation2] sm:$0xff]  ;;  %v845_v17 = vpack.c.bf16 %v406_v15, %v402_v14  ;;  %v413_v18 = vld [vmem:[#allocation2 + $0x68] sm:$0xff]  ;;  %v411_v19 = vld [vmem:[#allocation2 + $0x58] sm:$0xff]  ;;  %s800_s6 = sshll.u32 %s1154_s22, 3  ;;  %s656_s9 = sshll.u32 %s311_s15, 4  ;;  %s1442_s9 = int_to_ptr.vmem [resolvable:$true] %s656_s9 }
  0x89   : > { %v404_v11 = vld [vmem:[#allocation2 + $0x20] sm:$0xff]  ;;  %599 = vmatprep.mubr.f32.mxu0 %v1173_v0  ;;  %812 = vmatprep.subr.bf16.mxu1 %v811_v8  ;;  %v415_v20 = vld [vmem:[#allocation2 + $0x78] sm:$0xff]  ;;  %v815_v21 = vpack.c.bf16 %v413_v18, %v409_v16  ;;  %v410_v25 = vld [vmem:[#allocation2 + $0x50] sm:$0xff]  ;;  %s652_s13 = sadd.s32 %s800_s6, %s799_s14  ;;  %s1540_s12 = sld [smem:[#allocation21_spill]] }
  0x8a   : > { %v813_v13 = vpack.c.bf16 %v404_v11, %v400_v10  ;;  %844 = vmatprep.subr.bf16.mxu0 %v843_v12  ;;  %v847_v22 = vpack.c.bf16 %v415_v20, %v411_v19  ;;  %v408_v23 = vld [vmem:[#allocation2 + $0x40] sm:$0xff]  ;;  %v414_v27 = vld [vmem:[#allocation2 + $0x70] sm:$0xff]  ;;  %v417_v28 = vld [vmem:[#allocation2 + $0x88] sm:$0xff]  ;;  %s801_s16 = sshll.u32 %s652_s13, 6  ;;  %s640_s21 = scalar_lea.sflag [#allocation4], %s1420_s18 }
  0x8b   : > { %v412_v24 = vld [vmem:[#allocation2 + $0x60] sm:$0xff]  ;;  %846 = vmatpush1.bf16.msra.mxu0 %v845_v17  ;;  %v421_v29 = vld [vmem:[#allocation2 + $0xa8] sm:$0xff]  ;;  %v849_v30 = vpack.c.bf16 %v414_v27, %v410_v25  ;;  %v419_v32 = vld [vmem:[#allocation2 + $0x98] sm:$0xff]  ;;  %s1064_s22 = scalar_lea.vmem %s1442_s9, 256  ;;  %p1541_p1 = scmp.ne.s32.totalorder %s1528_s5, 0 }
  0x8c   : > { %814 = vmatpush1.bf16.msra.mxu1 %v813_v13  ;;  %v817_v26 = vpack.c.bf16 %v412_v24, %v408_v23  ;;  %848 = vmatprep.subr.bf16.mxu0 %v847_v22  ;;  %v819_v31 = vpack.c.bf16 %v421_v29, %v417_v28  ;;  %v423_v33 = vld [vmem:[#allocation2 + $0xb8] sm:$0xff]  ;;  %v416_v34 = vld [vmem:[#allocation2 + $0x80] sm:$0xff]  ;;  %v418_v37 = vld [vmem:[#allocation2 + $0x90] sm:$0xff]  ;;  %p1065_p4 = scmp.ne.s32.totalorder %s1442_s9, %s1064_s22  ;;  %s1176_s27 = smov [#allocation8]  }
  0x8d   : > { %816 = vmatprep.subr.bf16.mxu1 %v815_v21  ;;  %v851_v35 = vpack.c.bf16 %v423_v33, %v419_v32  ;;  %v420_v36 = vld [vmem:[#allocation2 + $0xa0] sm:$0xff]  ;;  %v422_v38 = vld [vmem:[#allocation2 + $0xb0] sm:$0xff]  ;;  %v425_v40 = vld [vmem:[#allocation2 + $0xc8] sm:$0xff]  ;;  %s1068_s29 = sshll.u32 %s1176_s27, 4  ;;  %s1069_s29 = int_to_ptr.vmem [resolvable:$false] %s1068_s29 }
  0x8e   : > { %v821_v39 = vpack.c.bf16 %v420_v36, %v416_v34  ;;  %v429_v41 = vld [vmem:[#allocation2 + $0xe8] sm:$0xff]  ;;  %v427_v42 = vld [vmem:[#allocation2 + $0xd8] sm:$0xff]  ;;  %v853_v43 = vpack.c.bf16 %v422_v38, %v418_v37  ;;  %v424_v46 = vld [vmem:[#allocation2 + $0xc0] sm:$0xff]  ;;  %p1066_p6 = pnand %p1065_p4, %p1541_p1  ;;  %s1070_s20 = scalar_lea.vmem %s1069_s29, 512 }
  0x8f   : > { %850 = vmatpush1.bf16.msra.mxu0 %v849_v30  ;;  %v823_v44 = vpack.c.bf16 %v429_v41, %v425_v40  ;;  %v431_v45 = vld [vmem:[#allocation2 + $0xf8] sm:$0xff]  ;;  %v428_v47 = vld [vmem:[#allocation2 + $0xe0] sm:$0xff]  ;;  %v426_v49 = vld [vmem:[#allocation2 + $0xd0] sm:$0xff]  ;;  %s1440_s28 = scalar_lea.hbm %s1540_s12, %s801_s16  ;;  %p1071_p0 = scmp.lt.s32.totalorder %s1442_s9, %s1069_s29 }
  0x90   : > { %818 = vmatpush1.bf16.msra.mxu1 %v817_v26  ;;  %852 = vmatprep.subr.bf16.mxu0 %v851_v35  ;;  %v855_v48 = vpack.c.bf16 %v431_v45, %v427_v42  ;;  %v430_v50 = vld [vmem:[#allocation2 + $0xf0] sm:$0xff]  ;;  %v433_v51 = vld [vmem:[#allocation2 + $0x108] sm:$0xff]  ;;  %v435_v53 = vld [vmem:[#allocation2 + $0x118] sm:$0xff]  ;;  %v825_v55 = vpack.c.bf16 %v428_v47, %v424_v46  ;;  %p1067_p12 = pneg %p1066_p6  ;;  %p1072_p9 = scmp.lt.s32.totalorder %s1070_s20, %s1064_s22 }
  0x91   : > { %820 = vmatprep.subr.bf16.mxu1 %v819_v31  ;;  %v437_v52 = vld [vmem:[#allocation2 + $0x128] sm:$0xff]  ;;  %v439_v54 = vld [vmem:[#allocation2 + $0x138] sm:$0xff]  ;;  %v857_v56 = vpack.c.bf16 %v430_v50, %v426_v49  ;;  %v432_v58 = vld [vmem:[#allocation2 + $0x100] sm:$0xff] }
  0x92   : > { %v827_v57 = vpack.c.bf16 %v437_v52, %v433_v51  ;;  %v436_v59 = vld [vmem:[#allocation2 + $0x120] sm:$0xff]  ;;  %v434_v60 = vld [vmem:[#allocation2 + $0x110] sm:$0xff]  ;;  %v859_v61 = vpack.c.bf16 %v439_v54, %v435_v53  ;;  %v441_v63 = vld [vmem:[#allocation2 + $0x148] sm:$0xff]  ;;  %p1073_p5 = por %p1072_p9, %p1071_p0 }
  0x93   : > { %854 = vmatpush1.bf16.msra.mxu0 %v853_v43  ;;  %v438_v62 = vld [vmem:[#allocation2 + $0x130] sm:$0xff]  ;;  %v445_v0 = vld [vmem:[#allocation2 + $0x168] sm:$0xff]  ;;  %v443_v1 = vld [vmem:[#allocation2 + $0x158] sm:$0xff]  ;;  %v829_v3 = vpack.c.bf16 %v436_v59, %v432_v58 }
  0x94   : > { %822 = vmatpush1.bf16.msra.mxu1 %v821_v39  ;;  %856 = vmatprep.subr.bf16.mxu0 %v855_v48  ;;  %v447_v2 = vld [vmem:[#allocation2 + $0x178] sm:$0xff]  ;;  %v861_v4 = vpack.c.bf16 %v438_v62, %v434_v60  ;;  %v831_v5 = vpack.c.bf16 %v445_v0, %v441_v63  ;;  %v440_v6 = vld [vmem:[#allocation2 + $0x140] sm:$0xff]  ;;  %v442_v8 = vld [vmem:[#allocation2 + $0x150] sm:$0xff]  ;;  %p1074_p7 = pnand %p1073_p5, %p1067_p12 }
  0x95   : > { %824 = vmatprep.subr.bf16.mxu1 %v823_v44  ;;  %v444_v7 = vld [vmem:[#allocation2 + $0x160] sm:$0xff]  ;;  %v863_v9 = vpack.c.bf16 %v447_v2, %v443_v1  ;;  %v446_v10 = vld [vmem:[#allocation2 + $0x170] sm:$0xff]  ;;  %v449_v11 = vld [vmem:[#allocation2 + $0x188] sm:$0xff] }
  0x96   : > { %v453_v12 = vld [vmem:[#allocation2 + $0x1a8] sm:$0xff]  ;;  %v451_v13 = vld [vmem:[#allocation2 + $0x198] sm:$0xff]  ;;  %v833_v15 = vpack.c.bf16 %v444_v7, %v440_v6  ;;  %v865_v16 = vpack.c.bf16 %v446_v10, %v442_v8  ;;  %v448_v18 = vld [vmem:[#allocation2 + $0x180] sm:$0xff] }
  0x97   : > { %858 = vmatpush1.bf16.msra.mxu0 %v857_v56  ;;  %v455_v14 = vld [vmem:[#allocation2 + $0x1b8] sm:$0xff]  ;;  %v835_v17 = vpack.c.bf16 %v453_v12, %v449_v11  ;;  %v452_v19 = vld [vmem:[#allocation2 + $0x1a0] sm:$0xff]  ;;  %v450_v20 = vld [vmem:[#allocation2 + $0x190] sm:$0xff] }
  0x98   : > { %826 = vmatpush1.bf16.msra.mxu1 %v825_v55  ;;  %860 = vmatprep.subr.bf16.mxu0 %v859_v61  ;;  %v867_v21 = vpack.c.bf16 %v455_v14, %v451_v13  ;;  %v454_v22 = vld [vmem:[#allocation2 + $0x1b0] sm:$0xff]  ;;  %v457_v23 = vld [vmem:[#allocation2 + $0x1c8] sm:$0xff]  ;;  %v459_v25 = vld [vmem:[#allocation2 + $0x1d8] sm:$0xff]  ;;  %v837_v27 = vpack.c.bf16 %v452_v19, %v448_v18 }
  0x99   : > { %828 = vmatprep.subr.bf16.mxu1 %v827_v57  ;;  %v461_v24 = vld [vmem:[#allocation2 + $0x1e8] sm:$0xff]  ;;  %v463_v26 = vld [vmem:[#allocation2 + $0x1f8] sm:$0xff]  ;;  %v869_v28 = vpack.c.bf16 %v454_v22, %v450_v20  ;;  %v456_v30 = vld [vmem:[#allocation2 + $0x1c0] sm:$0xff] }
  0x9a   : > { %v839_v29 = vpack.c.bf16 %v461_v24, %v457_v23  ;;  %v460_v31 = vld [vmem:[#allocation2 + $0x1e0] sm:$0xff]  ;;  %v871_v32 = vpack.c.bf16 %v463_v26, %v459_v25  ;;  %v458_v34 = vld [vmem:[#allocation2 + $0x1d0] sm:$0xff] }
  0x9b   : > { %862 = vmatpush1.bf16.msra.mxu0 %v861_v4  ;;  %v841_v33 = vpack.c.bf16 %v460_v31, %v456_v30  ;;  %v462_v35 = vld [vmem:[#allocation2 + $0x1f0] sm:$0xff] }
  0x9c   : > { %830 = vmatpush1.bf16.msra.mxu1 %v829_v3  ;;  %864 = vmatprep.subr.bf16.mxu0 %v863_v9  ;;  %v873_v36 = vpack.c.bf16 %v462_v35, %v458_v34  ;;  %v606_v41 = vld [vmem:[%s280_s24] sm:$0xff] }
  0x9d   : > { %832 = vmatprep.subr.bf16.mxu1 %v831_v5  ;;  %v608_v42 = vcombine.high %v606_v41, %v606_v41  ;;  %796 = vst.sshfl [vmem:[%s311_s15] sm:$0xf pattern:$0x76325410] %v606_v41 }
  0x9f   : > { %866 = vmatpush1.bf16.msra.mxu0 %v865_v16  ;;  %797 = vst.sshfl [vmem:[%s311_s15 + $0x8] sm:$0xf pattern:$0x76325410] %v608_v42 }
  0xa0   : > { %834 = vmatpush1.bf16.msra.mxu1 %v833_v15  ;;  %868 = vmatprep.subr.bf16.mxu0 %v867_v21 }
  0xa1   : > { %836 = vmatprep.subr.bf16.mxu1 %v835_v17 }
  0xa3   : > { %870 = vmatpush1.bf16.msra.mxu0 %v869_v28 }
  0xa4   : > { %838 = vmatpush1.bf16.msra.mxu1 %v837_v27  ;;  %872 = vmatprep.subr.bf16.mxu0 %v871_v32 }
  0xa5   : > { %840 = vmatprep.subr.bf16.mxu1 %v839_v29 }
  0xa7   : > { %874 = vmatpush1.bf16.msra.mxu0 %v873_v36 }
  0xa8   : > { %842 = vmatpush1.bf16.msra.mxu1 %v841_v33 }
 0x107   : > { %v320_v37 = vpop.permute.xlu0 %319 }
 0x15b   : > { %v396_v38 = vpop.f32.mrb[0].mxu0 }
 0x15c   : > { %v397_v39 = vadd.f32 %v396_v38, %v320_v37  ;;  %v810_v40 = vpop.f32.mrb[1].mxu0 }
 0x15e   : > { %529 = vmatmul.mubr.f32.vlgmr.msra.gmra.mrb[0].mxu1 %v397_v39  ;;  %600 = vmatmul.mubr.f32.vlgmr.msra.gmra.mrb[2].mxu0 %v397_v39 }
 0x231   : > { %v530_v43 = vpop.f32.mrb[0].mxu1  ;;  %v601_v44 = vpop.f32.mrb[2].mxu0 }
 0x232   : > { %v532_v45 = vpop.f32.mrb[1].mxu1  ;;  %v603_v46 = vpop.f32.mrb[3].mxu0 }
 0x233   : > { %v631_v47 = vcombine.low %v530_v43, %v532_v45  ;;  %v632_v48 = vcombine.low %v601_v44, %v603_v46 }
 0x235   : > { %v633_v49 = vrot.slane %v631_v47, 6  ;;  %v634_v50 = vrot.slane %v632_v48, 6 }
 0x237   : > { %637 = vst [vmem:[%s311_s15] sm:$0xcc] %v633_v49  ;;  %638 = vst [vmem:[%s311_s15 + $0x8] sm:$0xcc] %v634_v50 }
 0x238   : > { %1077 = shalt.err (!%p1074_p7)
}
 0x239   : > { %s1078_s18 = scalar_lea.hbm %s1440_s28, 256  ;;  %s1082_s8 = scalar_lea.hbm %s1540_s12, 1024 }
 0x23a   : > { %p1079_p10 = scmp.ne.s32.totalorder %s1440_s28, %s1078_s18  ;;  %p1083_p11 = scmp.lt.u32.totalorder %s1440_s28, %s1540_s12 }
 0x23b   : > { %p1084_p3 = scmp.lt.u32.totalorder %s1082_s8, %s1078_s18  ;;  %p1086_p4 = scmp.lt.u32.totalorder %s1078_s18, %s1440_s28 }
 0x23c   : > { %p1080_p13 = pnand %p1079_p10, %p1541_p1 }
 0x23d   : > { %p1085_p2 = por %p1084_p3, %p1083_p11 }
 0x23e   : > { %p1081_p8 = pneg %p1080_p13 }
 0x23f   : > { %p1087_p6 = por %p1086_p4, %p1085_p2 }
 0x241   : > { %p1088_p12 = pnand %p1087_p6, %p1081_p8 }
 0x243   : > { %1091 = shalt.err (!%p1088_p12)
}
 0x244   : > { %883 = dma.vmem_to_hbm [thread:$0]  (%p1541_p1), %s1442_s9, 256, %s1440_s28, %s640_s21  }
 0x245 PF: > { %s1542_s26 = sld [smem:[#allocation12_spill]]  ;;  %s1543_s10 = sld [smem:[#allocation19_spill]] }
 0x246   : > { %p903_p0 = scmp.ge.s32.totalorder %s1166_s25, 2 }
 0x24b   : > { %s668_s24 = sand.u32 1, %s1542_s26   ;;  %p1544_p9 = scmp.ne.s32.totalorder %s1543_s10, 0 }
 0x24c   : > { %s669_s15 = scalar_lea.sflag [#allocation4], %s668_s24 }
 0x24d   : > { %p897_p5 = pnand %p903_p0, %p1544_p9 }
 0x24f   : > { %1133 = dma.done.wait (!%p897_p5), %s669_s15, 256  }
 0x250   : > { %1135 = vsyncadd (!%p897_p5), %s669_s15, 4294967040  ;;  %s22_s25 = sadd.s32 1, %s1166_s25   ;;  %s1545_s14 = sld [smem:[#allocation13_spill]] }
 0x251   : > { %p19_p7 = scmp.ge.s32.totalorder %s22_s25, 6   ;;  %s1546_s20 = sld [smem:[#allocation18_spill]] }
 0x252   : > { %s1547_s21 = sld [smem:[#allocation14_spill]]  ;;  %s1548_s22 = sld [smem:[#allocation15_spill]] }
 0x253   : > { %s1549_s23 = sld [smem:[#allocation16_spill]]  ;;  %s1550_s24 = sld [smem:[#allocation17_spill]] }
 0x254   : > { %s1551_s18 = smov %s1142_s19  ;;  %21 = sbr.rel (!%p19_p7) target bundleno = 11 (0xb), region = 101 }
 0x256   : > { %s1552_s19 = smov %s1545_s14 }
 0x25b   :  { %674 = vsyncpa [#allocation3], 1 }
 0x25c   :  { %676 = vsyncpa [#allocation3 + $0x1], 1 }
 0x25d   :  { %677 = vsyncpa [#allocation6], 1 }
 0x25e   :  { %679 = vsyncpa [#allocation6 + $0x1], 1 }
 0x25f   :  { %680 = vsyncpa [#allocation4], 1 }
 0x260   :  { %682 = vsyncpa [#allocation4 + $0x1], 1 }

</bundles_post_ra>
